<compile_context>
chip_gen: v5e
topology: v5e:2x2
jax: 0.10.0
libtpu: 0.0.40
codegen_flags: <defaults>
</compile_context>

<pallas_src>
import jax
import jax.numpy as jnp
from jax import lax
from jax.experimental import pallas as pl
from jax.experimental.pallas import tpu as pltpu


_VMEM_BUDGET = 28 * 1024 * 1024   # explicit tile/scratch budget (fits v7x's 64 MiB)
_VMEM_LIMIT = 48 * 1024 * 1024    # scoped-VMEM limit handed to Mosaic


def _round_up(x, m):
    return ((x + m - 1) // m) * m


def _pick_divisor_tile(dim, cap):
    """Largest multiple of 128 that divides `dim` (a 128-multiple) and is <= cap."""
    cap = max(128, min(cap, dim))
    best, t = 128, 128
    while t <= cap:
        if dim % t == 0:
            best = t
        t += 128
    return best


def _vmem_bytes(tm, tn, tk, compute_itemsize, out_itemsize):
    return (2 * tm * tk * compute_itemsize   # activation tiles, double buffered
            + 2 * tk * tn                    # int8 weight tiles, double buffered
            + tk * tn * compute_itemsize     # in-kernel dequantized weight copy
            + 2 * tm * tn * out_itemsize     # output tiles, double buffered
            + tm * tn * 4                    # f32 accumulator scratch
            + 4 * tn * 4)                    # scale / bias rows


def _choose_tiles(M, N, K, compute_itemsize, out_itemsize, tm=None, tn=None, tk=None):
    Np = _round_up(N, 128)
    Kp = _round_up(K, 128)

    if tm is None:
        # Full-extent row tile for small/medium M (weight is read from HBM exactly
        # once); 512-row (256-multiple) tiles for large M to bound re-streaming.
        tm = _round_up(M, 8) if M <= 512 else 512
    Mp = _round_up(M, tm)

    if tn is None:
        tn = _pick_divisor_tile(Np, 512)
        # Megacore: with a single row block, keep >= 2 N blocks for 2 TensorCores.
        if Mp == tm and Np // tn < 2 and Np >= 256:
            tn = _pick_divisor_tile(Np, Np // 2)

    def fits(t):
        return _vmem_bytes(tm, tn, t, compute_itemsize, out_itemsize) <= _VMEM_BUDGET

    if tk is None:
        if Mp <= 256 and fits(Kp):
            tk = Kp                       # collapse the reduction: weight streams once
        else:
            tk = _pick_divisor_tile(Kp, 2048)
            while tk > 128 and not fits(tk):
                tk = _pick_divisor_tile(Kp, tk - 128)

    return tm, tn, tk, Mp, Np, Kp


def _make_qlinear_kernel(has_bias, multi_k):
    """Kernel variant factory: optional bias add, optional K-reduction grid axis."""

    def kernel(*refs):
        x_ref, w_ref, s_ref = refs[:3]
        idx = 3
        b_ref = None
        if has_bias:
            b_ref = refs[idx]
            idx += 1
        o_ref = refs[idx]

        if multi_k:
            acc_ref = refs[idx + 1]
            k = pl.program_id(2)

            @pl.when(k == 0)
            def _():
                acc_ref[...] = jnp.zeros_like(acc_ref)

            x = x_ref[...]                               # (tm, tk) compute dtype
            acc_ref[...] += jnp.dot(x, w_ref[...].astype(x.dtype),
                                    preferred_element_type=jnp.float32)

            @pl.when(k == pl.num_programs(2) - 1)
            def _():
                out = acc_ref[...] * s_ref[...]          # f32 epilogue
                if has_bias:
                    out = out + b_ref[...]
                o_ref[...] = out.astype(o_ref.dtype)
        else:
            # Single K block: no accumulator scratch, no init/finalize revisits.
            x = x_ref[...]
            acc = jnp.dot(x, w_ref[...].astype(x.dtype),
                          preferred_element_type=jnp.float32)
            out = acc * s_ref[...]
            if has_bias:
                out = out + b_ref[...]
            o_ref[...] = out.astype(o_ref.dtype)

    return kernel


def _quantized_linear(x, w_t, scales_row, bias_row, N, K, *,
                      compute_dtype=None, tm=None, tn=None, tk=None):
    """x: (M, K); w_t: (Kp, Np) int8 (pre-transposed, pre-padded);
    scales_row/bias_row: (1, Np) f32 (bias_row may be None)."""
    M = x.shape[0]
    out_dtype = x.dtype
    if compute_dtype is not None and compute_dtype != x.dtype:
        x = x.astype(compute_dtype)
    cdt_size = jnp.dtype(x.dtype).itemsize
    out_size = jnp.dtype(out_dtype).itemsize

    Kp, Np = w_t.shape
    tm, tn, tk, Mp, _, _ = _choose_tiles(M, N, K, cdt_size, out_size, tm, tn, tk)

    # Pad activations only when strictly necessary.
    if (Mp, Kp) != (M, K):
        x = jnp.pad(x, ((0, Mp - M), (0, Kp - K)))

    has_bias = bias_row is not None
    k_blocks = Kp // tk
    multi_k = k_blocks > 1

    cost = pl.CostEstimate(
        flops=2 * M * N * K,
        transcendentals=0,
        bytes_accessed=(M * K * cdt_size                 # activations
                        + N * K                          # int8 weight
                        + (2 if has_bias else 1) * N * 4  # scales (+ bias) f32
                        + M * N * out_size),             # output
    )

    kernel = _make_qlinear_kernel(has_bias, multi_k)
    operands = [x, w_t, scales_row] + ([bias_row] if has_bias else [])

    if multi_k:
        grid = (Mp // tm, Np // tn, k_blocks)
        in_specs = [
            pl.BlockSpec((tm, tk), lambda i, j, k: (i, k)),   # activations tile
            pl.BlockSpec((tk, tn), lambda i, j, k: (k, j)),   # int8 (K, N) weight tile
            pl.BlockSpec((1, tn), lambda i, j, k: (0, j)),    # f32 scales
        ]
        if has_bias:
            in_specs.append(pl.BlockSpec((1, tn), lambda i, j, k: (0, j)))
        out_spec = pl.BlockSpec((tm, tn), lambda i, j, k: (i, j))
        scratch = [pltpu.VMEM((tm, tn), jnp.float32)]
        dims = ("parallel", "parallel", "arbitrary")
    else:
        grid = (Mp // tm, Np // tn)
        in_specs = [
            pl.BlockSpec((tm, tk), lambda i, j: (i, 0)),
            pl.BlockSpec((tk, tn), lambda i, j: (0, j)),
            pl.BlockSpec((1, tn), lambda i, j: (0, j)),
        ]
        if has_bias:
            in_specs.append(pl.BlockSpec((1, tn), lambda i, j: (0, j)))
        out_spec = pl.BlockSpec((tm, tn), lambda i, j: (i, j))
        scratch = []
        dims = ("parallel", "parallel")

    out = pl.pallas_call(
        kernel,
        out_shape=jax.ShapeDtypeStruct((Mp, Np), out_dtype),
        grid_spec=pltpu.PrefetchScalarGridSpec(
            num_scalar_prefetch=0,
            grid=grid,
            in_specs=in_specs,
            out_specs=out_spec,
            scratch_shapes=scratch,
        ),
        compiler_params=pltpu.CompilerParams(
            dimension_semantics=dims,
            vmem_limit_bytes=_VMEM_LIMIT,
        ),
        cost_estimate=cost,
    )(*operands)

    if (Mp, Np) != (M, N):
        out = out[:M, :N]
    return out


class QuantizedLinear:
    """Pallas TPU equivalent of Quantize_Layers' forward pass.

    All weight layout work (transpose to (K, N), padding to 128 multiples, f32
    scale/bias rows) is done ONCE here, not per forward call.
    """

    def __init__(self, int8_weights, scales, bias=None, *, compute_dtype=None):
        N, K = int8_weights.shape
        self.N, self.K = N, K
        self.compute_dtype = compute_dtype

        Np, Kp = _round_up(N, 128), _round_up(K, 128)
        w_t = int8_weights.T                                    # (K, N) int8
        if (Kp, Np) != (K, N):
            w_t = jnp.pad(w_t, ((0, Kp - K), (0, Np - N)))
        self.w_t = w_t

        s = scales.reshape(1, N).astype(jnp.float32)
        if Np != N:
            s = jnp.pad(s, ((0, 0), (0, Np - N)))
        self.scales = s

        if bias is None:
            self.bias = None
        else:
            b = bias.reshape(1, N).astype(jnp.float32)
            if Np != N:
                b = jnp.pad(b, ((0, 0), (0, Np - N)))
            self.bias = b

    def __call__(self, x, *, tm=None, tn=None, tk=None):
        return _quantized_linear(x, self.w_t, self.scales, self.bias,
                                 self.N, self.K,
                                 compute_dtype=self.compute_dtype,
                                 tm=tm, tn=tn, tk=tk)


def quantize_layers_forward(x, int8_weights, scales, bias=None, *, compute_dtype=None):
    """One-shot convenience wrapper. For repeated calls, construct a
    QuantizedLinear once so the weight transpose/pad is not redone per call."""
    return QuantizedLinear(int8_weights, scales, bias,
                           compute_dtype=compute_dtype)(x)


def quantize_weights(weights):
    """Pure-JAX equivalent of Quantize_Layers.quantize() (host-side calibration);
    not a Pallas kernel — it is a one-time weight-prep utility."""
    w_f32 = weights.astype(jnp.float32)
    scales = jnp.max(jnp.abs(w_f32), axis=-1) / 127.0
    int8_w = jnp.round(w_f32 / scales[:, None]).astype(jnp.int8)
    return int8_w, scales.astype(weights.dtype)


def _reference(x, int8_weights, scales, bias, compute_dtype=None):
    xc = x if compute_dtype is None else x.astype(compute_dtype)
    acc = lax.dot_general(
        xc, int8_weights.astype(xc.dtype),
        dimension_numbers=(((1,), (1,)), ((), ())),
        preferred_element_type=jnp.float32,
        precision=lax.Precision.HIGHEST,
    )
    out = acc * scales.astype(jnp.float32)[None, :]
    if bias is not None:
        out = out + bias.astype(jnp.float32)
    return out.astype(x.dtype)


if __name__ == "__main__":
    key = jax.random.PRNGKey(0)

    # --- Small shapes consistent with the module: batch=8, in=32, out=32 ---
    batch, in_features, out_features = 8, 32, 32
    k_w, k_s, k_b, k_x = jax.random.split(key, 4)
    int8_weights = jax.random.randint(
        k_w, (out_features, in_features), minval=-128, maxval=127, dtype=jnp.int8)
    scales = jax.random.normal(k_s, (out_features,), dtype=jnp.float32)
    bias = jax.random.normal(k_b, (1, out_features), dtype=jnp.float32)
    x = jax.random.normal(k_x, (batch, in_features), dtype=jnp.float32)

    layer = QuantizedLinear(int8_weights, scales, bias)
    out = jax.block_until_ready(layer(x))
    ref = _reference(x, int8_weights, scales, bias)
    assert out.shape == (batch, out_features)
    assert jnp.allclose(out, ref, atol=1e-3, rtol=1e-4)

    # --- Non-tile-multiple shapes: padding + single-K (collapsed reduction) path ---
    b2, in2, out2 = 200, 160, 192
    k_w2, k_s2, k_b2, k_x2 = jax.random.split(jax.random.PRNGKey(1), 4)
    w2 = jax.random.randint(k_w2, (out2, in2), minval=-128, maxval=127, dtype=jnp.int8)
    s2 = jax.random.normal(k_s2, (out2,), dtype=jnp.float32)
    bi2 = jax.random.normal(k_b2, (1, out2), dtype=jnp.float32)
    x2 = jax.random.normal(k_x2, (b2, in2), dtype=jnp.float32)

    layer2 = QuantizedLinear(w2, s2, bi2)
    out2_k = jax.block_until_ready(layer2(x2))
    ref2 = _reference(x2, w2, s2, bi2)
    assert out2_k.shape == (b2, out2)
    assert jnp.allclose(out2_k, ref2, atol=1e-2, rtol=1e-4)

    # --- Forced tiles to exercise the 3-D multi-K accumulator path ---
    b3, in3, out3 = 64, 512, 256
    k_w3, k_s3, k_b3, k_x3 = jax.random.split(jax.random.PRNGKey(2), 4)
    w3 = jax.random.randint(k_w3, (out3, in3), minval=-128, maxval=127, dtype=jnp.int8)
    s3 = jax.random.normal(k_s3, (out3,), dtype=jnp.float32)
    bi3 = jax.random.normal(k_b3, (1, out3), dtype=jnp.float32)
    x3 = jax.random.normal(k_x3, (b3, in3), dtype=jnp.float32)

    layer3 = QuantizedLinear(w3, s3, bi3)
    out3_k = jax.block_until_ready(layer3(x3, tm=64, tn=128, tk=128))
    ref3 = _reference(x3, w3, s3, bi3)
    assert jnp.allclose(out3_k, ref3, atol=1e-2, rtol=1e-4)

    # --- No-bias kernel variant ---
    layer_nb = QuantizedLinear(int8_weights, scales, None)
    out_nb = jax.block_until_ready(layer_nb(x))
    ref_nb = _reference(x, int8_weights, scales, None)
    assert jnp.allclose(out_nb, ref_nb, atol=1e-3, rtol=1e-4)

    # --- bf16 compute path (f32 accumulation; weights exact, activations rounded) ---
    layer_bf16 = QuantizedLinear(w2, s2, bi2, compute_dtype=jnp.bfloat16)
    out_bf16 = jax.block_until_ready(layer_bf16(x2))
    ref_bf16 = _reference(x2, w2, s2, bi2, compute_dtype=jnp.bfloat16)
    assert jnp.allclose(out_bf16, ref_bf16, atol=5e-2, rtol=5e-3)

    # --- One-shot convenience wrapper ---
    out_conv = jax.block_until_ready(quantize_layers_forward(x, int8_weights, scales, bias))
    assert jnp.allclose(out_conv, ref, atol=1e-3, rtol=1e-4)

    print("KERNEL_OK")
</pallas_src>

<mosaic_0001>
module attributes {stable_mosaic.version = 11 : i64} {
  func.func @kernel(%arg0: i32, %arg1: i32, %arg2: memref<8x128xf32, #tpu.memory_space<vmem>>, %arg3: memref<128x128xi8, #tpu.memory_space<vmem>>, %arg4: memref<1x128xf32, #tpu.memory_space<vmem>>, %arg5: memref<1x128xf32, #tpu.memory_space<vmem>>, %arg6: memref<8x128xf32, #tpu.memory_space<vmem>>) attributes {dimension_semantics = [#tpu.dimension_semantics<parallel>, #tpu.dimension_semantics<parallel>], iteration_bounds = array<i64: 1, 1>, scalar_prefetch = 0 : i64, scratch_operands = 0 : i64, tpu.core_type = #tpu.core_type<tc>, window_params = [{transform_indices = @transform_0, window_bounds = array<i64: 8, 128>}, {transform_indices = @transform_1, window_bounds = array<i64: 128, 128>}, {transform_indices = @transform_2, window_bounds = array<i64: 1, 128>}, {transform_indices = @transform_3, window_bounds = array<i64: 1, 128>}, {transform_indices = @transform_4, window_bounds = array<i64: 8, 128>}]} {
    %c0 = arith.constant 0 : index
    %c0_0 = arith.constant 0 : index
    %0 = vector.load %arg2[%c0, %c0_0] : memref<8x128xf32, #tpu.memory_space<vmem>>, vector<8x128xf32>
    %c0_1 = arith.constant 0 : index
    %c0_2 = arith.constant 0 : index
    %1 = vector.load %arg3[%c0_1, %c0_2] : memref<128x128xi8, #tpu.memory_space<vmem>>, vector<128x128xi8>
    %2 = arith.sitofp %1 : vector<128x128xi8> to vector<128x128xf32>
    %cst = arith.constant dense<0.000000e+00> : vector<8x128xf32>
    %3 = tpu.matmul %0, %2, %cst {dimension_numbers = #tpu.dot_dimension_numbers<[1], [0], [0], [1], [0, 0, 1, 1], [], []>} : vector<8x128xf32>, vector<128x128xf32>, vector<8x128xf32> -> vector<8x128xf32>
    %c0_3 = arith.constant 0 : index
    %c0_4 = arith.constant 0 : index
    %4 = vector.load %arg4[%c0_3, %c0_4] : memref<1x128xf32, #tpu.memory_space<vmem>>, vector<1x128xf32>
    %5 = vector.broadcast %4 : vector<1x128xf32> to vector<8x128xf32>
    %6 = arith.mulf %3, %5 : vector<8x128xf32>
    %c0_5 = arith.constant 0 : index
    %c0_6 = arith.constant 0 : index
    %7 = vector.load %arg5[%c0_5, %c0_6] : memref<1x128xf32, #tpu.memory_space<vmem>>, vector<1x128xf32>
    %8 = vector.broadcast %7 : vector<1x128xf32> to vector<8x128xf32>
    %9 = arith.addf %6, %8 : vector<8x128xf32>
    %c0_7 = arith.constant 0 : index
    %c0_8 = arith.constant 0 : index
    %10 = vector.load %arg6[%c0_7, %c0_8] : memref<8x128xf32, #tpu.memory_space<vmem>>, vector<8x128xf32>
    tpu.vector_store %arg6[%c0_7, %c0_8], %9 {strides = array<i32>} : memref<8x128xf32, #tpu.memory_space<vmem>>, vector<8x128xf32>,
    return
  }
  func.func @transform_0(%arg0: i32, %arg1: i32) -> (i32, i32) {
    %c0_i32 = arith.constant 0 : i32
    %c0_i32_0 = arith.constant 0 : i32
    return %arg0, %c0_i32 : i32, i32
  }
  func.func @transform_1(%arg0: i32, %arg1: i32) -> (i32, i32) {
    %c0_i32 = arith.constant 0 : i32
    %c0_i32_0 = arith.constant 0 : i32
    return %c0_i32, %arg1 : i32, i32
  }
  func.func @transform_2(%arg0: i32, %arg1: i32) -> (i32, i32) {
    %c0_i32 = arith.constant 0 : i32
    %c0_i32_0 = arith.constant 0 : i32
    return %c0_i32, %arg1 : i32, i32
  }
  func.func @transform_3(%arg0: i32, %arg1: i32) -> (i32, i32) {
    %c0_i32 = arith.constant 0 : i32
    %c0_i32_0 = arith.constant 0 : i32
    return %c0_i32, %arg1 : i32, i32
  }
  func.func @transform_4(%arg0: i32, %arg1: i32) -> (i32, i32) {
    %c0_i32 = arith.constant 0 : i32
    return %arg0, %arg1 : i32, i32
  }
}

</mosaic_0001>

<bundles_post_ra>
// kernel: tpu_custom_call.1
= control target key start
LH: loop header
LB: loop body
LE: loop exit
PB: predicated region body
PF: predicated region fallthrough
CT: control target
= control target key end

     0   :  { %9 = vsyncpa [#allocation3], 0  ;;  %s264_s0 = inlined_call_operand.hbm [shape: f32[8,128], index: 0, kind: input, shape index: {}]   ;;  %s265_s1 = inlined_call_operand.hbm [shape: s8[128,128], index: 1, kind: input, shape index: {}]   ;;  %s266_s2 = inlined_call_operand.vmem [shape: f32[1,128], index: 2, kind: input, shape index: {}]   ;;  %s267_s3 = inlined_call_operand.vmem [shape: f32[1,128], index: 3, kind: input, shape index: {}]   ;;  %s268_s4 = inlined_call_operand.hbm [shape: f32[8,128], index: 4, kind: output, shape index: {}]  }
   0x1   :  { %10 = vsyncpa [#allocation6], 0 }
   0x2   :  { %11 = vsyncpa [#allocation4], 0  ;;  %s17_s17 = sshll.u32 %s264_s0, 4  ;;  %s219_s18 = smov [#allocation2]   ;;  %s18_s17 = int_to_ptr.hbm [resolvable:$true] %s17_s17 }
   0x3   :  { %s19_s19 = sshll.u32 %s219_s18, 4  ;;  %s27_s22 = sshll.u32 %s265_s1, 4  ;;  %s20_s19 = int_to_ptr.vmem [resolvable:$true] %s19_s19  ;;  %s28_s22 = int_to_ptr.hbm [resolvable:$true] %s27_s22 }
   0x4   :  { %22 = dma.hbm_to_vmem [thread:$0]  %s18_s17, 128, %s20_s19, [#allocation3]  }
   0x5   :  { %s220_s23 = smov [#allocation5]   ;;  %s221_s25 = smov 128  }
   0x6   :  { %s29_s24 = sshll.u32 %s220_s23, 4  ;;  %s222_s26 = smov 8   ;;  %s30_s24 = int_to_ptr.vmem [resolvable:$true] %s29_s24 }
   0x7   :  { %35 = dma.hbm_to_vmem [thread:$0]  %s28_s22, 512, %s30_s24, [#allocation6], %s221_s25, %s221_s25, %s222_s26  }
   0x8   :  { %213 = dma.done.wait [#allocation3], 128  }
   0x9   :  { %214 = vsyncadd [#allocation3], 4294967168 }
   0xa   :  { %215 = dma.done.wait [#allocation6], 512  }
   0xb   :  { %216 = vsyncadd [#allocation6], 4294966784  ;;  %v52_v0 = vld [vmem:[#allocation5 + $0x18] sm:$0xff]  ;;  %v51_v4 = vld [vmem:[#allocation5 + $0x10] sm:$0xff]  ;;  %s223_s29 = smov [#allocation7]   ;;  %s123_s7 = sshll.u32 %s268_s4, 4  ;;  %s124_s7 = int_to_ptr.hbm [resolvable:$true] %s123_s7 }
   0xc   :  { %v68_v1 = vunpack.c.3.s8 %v52_v0  ;;  %v67_v2 = vunpack.c.2.s8 %v52_v0  ;;  %v66_v3 = vunpack.c.1.s8 %v52_v0  ;;  %v65_v7 = vunpack.c.0.s8 %v52_v0  ;;  %v50_v14 = vld [vmem:[#allocation5 + $0x8] sm:$0xff]  ;;  %v49_v23 = vld [vmem:[#allocation5] sm:$0xff]  ;;  %v48_v36 = vld [vmem:[#allocation2] sm:$0xff]  ;;  %s121_s30 = sshll.u32 %s223_s29, 4  ;;  %s122_s30 = int_to_ptr.vmem [resolvable:$true] %s121_s30 }
   0xd   :  { %v64_v9 = vunpack.c.3.s8 %v51_v4  ;;  %v63_v11 = vunpack.c.2.s8 %v51_v4  ;;  %v62_v13 = vunpack.c.1.s8 %v51_v4  ;;  %v61_v16 = vunpack.c.0.s8 %v51_v4  ;;  %v139_v37 = vld [vmem:[%s266_s2] ss:$0 sm:$0xff] }
   0xe   :  { %v84_v5 = vcvt.s32.f32 %v68_v1  ;;  %v83_v6 = vcvt.s32.f32 %v67_v2  ;;  %v82_v8 = vcvt.s32.f32 %v66_v3  ;;  %v81_v10 = vcvt.s32.f32 %v65_v7  ;;  %v140_v38 = vld [vmem:[%s267_s3] ss:$0 sm:$0xff] }
   0xf   :  { %v80_v12 = vcvt.s32.f32 %v64_v9  ;;  %v79_v15 = vcvt.s32.f32 %v63_v11  ;;  %v78_v17 = vcvt.s32.f32 %v62_v13  ;;  %v60_v18 = vunpack.c.3.s8 %v50_v14 }
  0x10   :  { %85 = vmatpush.msra.mxu0 %v84_v5  ;;  %v77_v19 = vcvt.s32.f32 %v61_v16  ;;  %v59_v20 = vunpack.c.2.s8 %v50_v14  ;;  %v58_v22 = vunpack.c.1.s8 %v50_v14  ;;  %v57_v25 = vunpack.c.0.s8 %v50_v14 }
  0x11   :  { %v76_v21 = vcvt.s32.f32 %v60_v18  ;;  %v56_v27 = vunpack.c.3.s8 %v49_v23  ;;  %v55_v29 = vunpack.c.2.s8 %v49_v23  ;;  %v54_v31 = vunpack.c.1.s8 %v49_v23 }
  0x12   :  { %86 = vmatpush.msra.mxu0 %v83_v6  ;;  %v75_v24 = vcvt.s32.f32 %v59_v20  ;;  %v74_v26 = vcvt.s32.f32 %v58_v22  ;;  %v73_v28 = vcvt.s32.f32 %v57_v25  ;;  %v53_v33 = vunpack.c.0.s8 %v49_v23 }
  0x13   :  { %v72_v30 = vcvt.s32.f32 %v56_v27  ;;  %v71_v32 = vcvt.s32.f32 %v55_v29  ;;  %v70_v34 = vcvt.s32.f32 %v54_v31 }
  0x14   :  { %87 = vmatpush.msra.mxu0 %v82_v8  ;;  %v69_v35 = vcvt.s32.f32 %v53_v33 }
  0x16   :  { %88 = vmatpush.msra.mxu0 %v81_v10 }
  0x18   :  { %89 = vmatpush.msra.mxu0 %v80_v12 }
  0x1a   :  { %90 = vmatpush.msra.mxu0 %v79_v15 }
  0x1c   :  { %91 = vmatpush.msra.mxu0 %v78_v17 }
  0x1e   :  { %92 = vmatpush.msra.mxu0 %v77_v19 }
  0x20   :  { %93 = vmatpush.msra.mxu0 %v76_v21 }
  0x22   :  { %94 = vmatpush.msra.mxu0 %v75_v24 }
  0x24   :  { %95 = vmatpush.msra.mxu0 %v74_v26 }
  0x26   :  { %96 = vmatpush.msra.mxu0 %v73_v28 }
  0x28   :  { %97 = vmatpush.msra.mxu0 %v72_v30 }
  0x2a   :  { %98 = vmatpush.msra.mxu0 %v71_v32 }
  0x2c   :  { %99 = vmatpush.msra.mxu0 %v70_v34 }
  0x2e   :  { %100 = vmatpush.msra.mxu0 %v69_v35 }
  0x2f   :  { %101 = vmatmul.f32.vlgmr.msra.gmra.mxu0 %v48_v36 }
  0xac   :  { %v102_v39 = vpop.f32.mrf.mxu0 }
  0xad   :  { %v109_v40 = vmul.f32 %v139_v37, %v102_v39 }
  0xaf   :  { %v114_v41 = vadd.f32 %v140_v38, %v109_v40 }
  0xb1   :  { %115 = vst [vmem:[#allocation7] sm:$0xff] %v114_v41 }
  0xb2   :  { %126 = dma.vmem_to_hbm [thread:$0]  %s122_s30, 128, %s124_s7, [#allocation4]  }
  0xb3   :  { %217 = dma.done.wait [#allocation4], 128  }
  0xb4   :  { %218 = vsyncadd [#allocation4], 4294967168 }
  0xb5   :  { %131 = vsyncpa [#allocation3], 1 }
  0xb6   :  { %132 = vsyncpa [#allocation6], 1 }
  0xb7   :  { %133 = vsyncpa [#allocation4], 1 }

</bundles_post_ra>
